<compile_context>
chip_gen: v6e
topology: v6e:2x2x1
jax: 0.10.0
libtpu: 0.0.40
codegen_flags: <defaults>
</compile_context>

<pallas_src>
import jax
import jax.numpy as jnp
from jax.experimental import pallas as pl
from jax.experimental.pallas import tpu as pltpu


def _round_up(x: int, m: int) -> int:
    return ((x + m - 1) // m) * m


def _make_encoder_kernel(num_layers_total: int, non_linear: bool):
    """Fused MLP kernel.

    Ref order: (x_ref, c_ref,
                w0_x, w0_c, b0,
                w_1, b_1, ..., w_{T-1}, b_{T-1},
                out_ref)
    where T == num_layers_total (hidden encoder layers + one fused,
    lane-padded mu||logvar head).  ReLU (when non_linear) follows every layer
    except the last (the head).
    """

    def kernel(x_ref, c_ref, *refs):
        out_ref = refs[-1]
        params = refs[:-1]

        # Layer 0: fused concat -> split matmul over x and c.
        w_x, w_c, b0 = params[0], params[1], params[2]
        h = (jnp.dot(x_ref[...].astype(w_x.dtype), w_x[...],
                     preferred_element_type=jnp.float32)
             + jnp.dot(c_ref[...].astype(w_c.dtype), w_c[...],
                       preferred_element_type=jnp.float32)
             + b0[...].astype(jnp.float32))
        if non_linear and num_layers_total > 1:
            h = jnp.maximum(h, 0.0)

        idx = 3
        for layer in range(1, num_layers_total):
            w, b = params[idx], params[idx + 1]
            idx += 2
            h = (jnp.dot(h.astype(w.dtype), w[...],
                         preferred_element_type=jnp.float32)
                 + b[...].astype(jnp.float32))
            if non_linear and layer < num_layers_total - 1:
                h = jnp.maximum(h, 0.0)

        out_ref[...] = h.astype(out_ref.dtype)

    return kernel


class PallasEncoder:
    """JAX / Pallas port of the PyTorch `Encoder` module."""

    def __init__(self, input_dim, hidden_dim, c_dim, non_linear=False,
                 key=None, param_dtype=jnp.bfloat16, tile_b=1024):
        self.input_dim = int(input_dim)
        self.hidden_dims = list(hidden_dim)
        self.z_dim = int(self.hidden_dims[-1])
        self.c_dim = int(c_dim)
        self.non_linear = bool(non_linear)
        self.param_dtype = param_dtype
        self.tile_b = int(tile_b)
        self.layer_sizes = [self.input_dim + self.c_dim] + self.hidden_dims

        if key is None:
            key = jax.random.PRNGKey(0)

        # PyTorch-style U(-1/sqrt(fan_in), +1/sqrt(fan_in)) init (f32 masters).
        def init_linear(k, d_in, d_out):
            kw, kb = jax.random.split(k)
            bound = 1.0 / (float(d_in) ** 0.5)
            w = jax.random.uniform(kw, (d_in, d_out), jnp.float32, -bound, bound)
            b = jax.random.uniform(kb, (1, d_out), jnp.float32, -bound, bound)
            return w, b

        dims = list(zip(self.layer_sizes[:-1], self.layer_sizes[1:]))
        n_total = len(dims)  # total linear layers in the nn.Linear chain
        keys = jax.random.split(key, n_total + 2)

        # Hidden (non-final) encoder layers, f32 master copies.
        self.encoder_layers = [init_linear(keys[i], d0, d1)
                               for i, (d0, d1) in enumerate(dims[:-1])]
        d_pen, d_z = self.layer_sizes[-2], self.layer_sizes[-1]
        self.mean_layer = init_linear(keys[n_total], d_pen, d_z)
        self.logvar_layer = init_linear(keys[n_total + 1], d_pen, d_z)

        # ---- Fused mu||logvar head, zero-padded to a lane-dense width -----
        self.out_width = max(128, _round_up(2 * d_z, 128))
        w_head = jnp.concatenate([self.mean_layer[0], self.logvar_layer[0]],
                                 axis=1)                      # (d_pen, 2*z)
        b_head = jnp.concatenate([self.mean_layer[1], self.logvar_layer[1]],
                                 axis=1)                      # (1, 2*z)
        pad_cols = self.out_width - 2 * d_z
        if pad_cols:
            w_head = jnp.pad(w_head, ((0, 0), (0, pad_cols)))
            b_head = jnp.pad(b_head, ((0, 0), (0, pad_cols)))

        chain = list(self.encoder_layers) + [(w_head, b_head)]
        self.num_layers_total = len(chain)

        # Split layer 0's weight by rows (x part / c part) so the kernel can
        # consume x and c without a JAX-side concat.
        w0, b0 = chain[0]
        w0_x, w0_c = w0[:self.input_dim], w0[self.input_dim:]

        flat = [w0_x.astype(param_dtype), w0_c.astype(param_dtype),
                b0.astype(jnp.float32)]
        for (w, b) in chain[1:]:
            flat.append(w.astype(param_dtype))
            flat.append(b.astype(jnp.float32))
        self._flat_params = flat
        self._param_bytes = sum(int(p.size) * p.dtype.itemsize for p in flat)
        self._flops_per_row = 2 * sum(int(w.shape[0]) * int(w.shape[1])
                                      for (w, _) in chain)
        self._max_feat = max([int(w.shape[1]) for (w, _) in chain] + [128])

        self._kernel = _make_encoder_kernel(self.num_layers_total,
                                            self.non_linear)

    # ------------------------------------------------------------------ #
    def _choose_tile(self, batch: int) -> int:
        tile_b = min(self.tile_b, _round_up(batch, 8))
        tile_b = _round_up(tile_b, 8)
        # v7x has 2 TensorCores: make sure the batch axis has >= 2 grid
        # steps (when the batch allows) so ("parallel",) can shard it.
        if pl.cdiv(batch, tile_b) <= 1 and batch >= 16:
            tile_b = _round_up(pl.cdiv(batch, 2), 8)
        return tile_b

    def __call__(self, x, c):
        c = c.reshape(-1, self.c_dim)
        act_dtype = self.param_dtype
        x = x.astype(act_dtype)          # bf16 streaming by default
        c = c.astype(act_dtype)
        batch = int(x.shape[0])

        tile_b = self._choose_tile(batch)
        # No jnp.pad: ragged final block is handled (masked writes) by Pallas.
        grid = (pl.cdiv(batch, tile_b),)
        out_width = self.out_width

        # Activation tiles stream over the batch grid axis.
        x_spec = pl.BlockSpec((tile_b, self.input_dim), lambda i: (i, 0))
        c_spec = pl.BlockSpec((tile_b, self.c_dim), lambda i: (i, 0))
        out_spec = pl.BlockSpec((tile_b, out_width), lambda i: (i, 0))
        # Weights / biases: whole-array VMEM residency, single buffered
        # (grid-invariant operands are copied in once, no double-buffer).
        param_specs = [pl.BlockSpec(memory_space=pltpu.MemorySpace.VMEM)
                       for _ in self._flat_params]

        # Advisory cost estimate.
        flops = self._flops_per_row * batch
        bytes_accessed = (self._param_bytes
                          + int(x.size) * x.dtype.itemsize
                          + int(c.size) * c.dtype.itemsize
                          + batch * out_width * 4)
        cost = pl.CostEstimate(flops=int(flops), transcendentals=0,
                               bytes_accessed=int(bytes_accessed))

        # VMEM budget: single-buffered resident params + double-buffered
        # streamed activation tiles + intermediate activations + headroom,
        # capped generation-aware (v5e/v6e: 128 MiB phys, v7x: 64 MiB).
        in_tile_bytes = tile_b * (self.input_dim + self.c_dim) * x.dtype.itemsize
        out_tile_bytes = tile_b * out_width * 4
        act_bytes = tile_b * self._max_feat * 4
        needed = (self._param_bytes + 2 * (in_tile_bytes + out_tile_bytes)
                  + 4 * act_bytes + (2 << 20))
        try:
            phys_vmem = int(pltpu.get_tpu_info().vmem_capacity_bytes)
        except Exception:
            phys_vmem = 64 << 20   # conservative (v7x per-TC)
        cap = max(int(phys_vmem * 4 // 5), 32 << 20)
        vmem_limit = int(min(max(needed, 8 << 20), cap))
        # TODO(synk): if single-buffered params alone exceed ~40 MiB (very
        # large hidden dims on v7x), add a K-tiled fallback (reduction grid
        # axis / pltpu.emit_pipeline over K blocks) instead of whole-weight
        # VMEM residency.

        out = pl.pallas_call(
            self._kernel,
            out_shape=jax.ShapeDtypeStruct((batch, out_width), jnp.float32),
            grid=grid,
            in_specs=[x_spec, c_spec] + param_specs,
            out_specs=out_spec,
            compiler_params=pltpu.CompilerParams(
                dimension_semantics=("parallel",),
                vmem_limit_bytes=vmem_limit),
            cost_estimate=cost,
        )(x, c, *self._flat_params)

        mu = out[:, :self.z_dim]
        logvar = out[:, self.z_dim:2 * self.z_dim]
        return mu, logvar

    # Pure-JAX reference (mirrors the PyTorch forward exactly, f32 params).
    def reference(self, x, c):
        c = c.reshape(-1, self.c_dim).astype(jnp.float32)
        h = jnp.concatenate([x.astype(jnp.float32), c], axis=1)
        for (w, b) in self.encoder_layers:
            h = h @ w + b
            if self.non_linear:
                h = jnp.maximum(h, 0.0)
        mu = h @ self.mean_layer[0] + self.mean_layer[1]
        logvar = h @ self.logvar_layer[0] + self.logvar_layer[1]
        return mu, logvar


if __name__ == "__main__":
    key = jax.random.PRNGKey(0)
    k_x, k_c, k_params = jax.random.split(key, 3)

    batch = 8
    input_dim = 16
    c_dim = 4
    hidden_dim = [32, 8]          # z_dim = 8

    x = jax.random.normal(k_x, (batch, input_dim), jnp.float32)
    c = jax.random.normal(k_c, (batch, c_dim, 1), jnp.float32)  # reshaped inside

    # f32-parameter instance: exact check against the pure-JAX reference.
    enc_f32 = PallasEncoder(input_dim, hidden_dim, c_dim, non_linear=True,
                            key=k_params, param_dtype=jnp.float32)
    mu32, lv32 = enc_f32(x, c)
    jax.block_until_ready((mu32, lv32))
    mu_ref, lv_ref = enc_f32.reference(x, c)
    assert mu32.shape == (batch, hidden_dim[-1])
    assert lv32.shape == (batch, hidden_dim[-1])
    assert jnp.allclose(mu32, mu_ref, atol=1e-5, rtol=1e-5)
    assert jnp.allclose(lv32, lv_ref, atol=1e-5, rtol=1e-5)

    # Default bf16-parameter / bf16-activation path (MXU-native, halved DMA).
    enc_bf16 = PallasEncoder(input_dim, hidden_dim, c_dim, non_linear=True,
                             key=k_params)
    mu16, lv16 = enc_bf16(x, c)
    jax.block_until_ready((mu16, lv16))
    assert mu16.shape == (batch, hidden_dim[-1])
    assert lv16.shape == (batch, hidden_dim[-1])
    assert jnp.allclose(mu16, mu_ref, atol=5e-2, rtol=5e-2)
    assert jnp.allclose(lv16, lv_ref, atol=5e-2, rtol=5e-2)

    print("KERNEL_OK")
</pallas_src>

<mosaic_0001>
module attributes {stable_mosaic.version = 11 : i64} {
  func.func @kernel(%arg0: i32, %arg1: memref<8x16xf32, #tpu.memory_space<vmem>>, %arg2: memref<8x4xf32, #tpu.memory_space<vmem>>, %arg3: memref<16x32xf32, #tpu.memory_space<vmem>>, %arg4: memref<4x32xf32, #tpu.memory_space<vmem>>, %arg5: memref<1x32xf32, #tpu.memory_space<vmem>>, %arg6: memref<32x128xf32, #tpu.memory_space<vmem>>, %arg7: memref<1x128xf32, #tpu.memory_space<vmem>>, %arg8: memref<8x128xf32, #tpu.memory_space<vmem>>) attributes {dimension_semantics = [#tpu.dimension_semantics<parallel>], iteration_bounds = array<i64: 1>, scalar_prefetch = 0 : i64, scratch_operands = 0 : i64, tpu.core_type = #tpu.core_type<tc>, window_params = [{transform_indices = @transform_0, window_bounds = array<i64: 8, 16>}, {transform_indices = @transform_1, window_bounds = array<i64: 8, 4>}, {pipeline_mode = #tpu.pipeline_mode<synchronous>, transform_indices = @transform_2, window_bounds = array<i64: 16, 32>}, {pipeline_mode = #tpu.pipeline_mode<synchronous>, transform_indices = @transform_3, window_bounds = array<i64: 4, 32>}, {pipeline_mode = #tpu.pipeline_mode<synchronous>, transform_indices = @transform_4, window_bounds = array<i64: 1, 32>}, {pipeline_mode = #tpu.pipeline_mode<synchronous>, transform_indices = @transform_5, window_bounds = array<i64: 32, 128>}, {pipeline_mode = #tpu.pipeline_mode<synchronous>, transform_indices = @transform_6, window_bounds = array<i64: 1, 128>}, {transform_indices = @transform_7, window_bounds = array<i64: 8, 128>}]} {
    %c0 = arith.constant 0 : index
    %c0_0 = arith.constant 0 : index
    %0 = vector.load %arg1[%c0, %c0_0] : memref<8x16xf32, #tpu.memory_space<vmem>>, vector<8x16xf32>
    %c0_1 = arith.constant 0 : index
    %c0_2 = arith.constant 0 : index
    %1 = vector.load %arg3[%c0_1, %c0_2] : memref<16x32xf32, #tpu.memory_space<vmem>>, vector<16x32xf32>
    %cst = arith.constant dense<0.000000e+00> : vector<8x32xf32>
    %2 = tpu.matmul %0, %1, %cst {dimension_numbers = #tpu.dot_dimension_numbers<[1], [0], [0], [1], [0, 0, 1, 1], [], []>} : vector<8x16xf32>, vector<16x32xf32>, vector<8x32xf32> -> vector<8x32xf32>
    %c0_3 = arith.constant 0 : index
    %c0_4 = arith.constant 0 : index
    %3 = vector.load %arg2[%c0_3, %c0_4] : memref<8x4xf32, #tpu.memory_space<vmem>>, vector<8x4xf32>
    %c0_5 = arith.constant 0 : index
    %c0_6 = arith.constant 0 : index
    %4 = vector.load %arg4[%c0_5, %c0_6] : memref<4x32xf32, #tpu.memory_space<vmem>>, vector<4x32xf32>
    %cst_7 = arith.constant dense<0.000000e+00> : vector<8x32xf32>
    %5 = tpu.matmul %3, %4, %cst_7 {dimension_numbers = #tpu.dot_dimension_numbers<[1], [0], [0], [1], [0, 0, 1, 1], [], []>} : vector<8x4xf32>, vector<4x32xf32>, vector<8x32xf32> -> vector<8x32xf32>
    %6 = arith.addf %2, %5 : vector<8x32xf32>
    %c0_8 = arith.constant 0 : index
    %c0_9 = arith.constant 0 : index
    %7 = vector.load %arg5[%c0_8, %c0_9] : memref<1x32xf32, #tpu.memory_space<vmem>>, vector<1x32xf32>
    %8 = vector.broadcast %7 : vector<1x32xf32> to vector<8x32xf32>
    %9 = arith.addf %6, %8 : vector<8x32xf32>
    %cst_10 = arith.constant 0.000000e+00 : f32
    %10 = vector.broadcast %cst_10 : f32 to vector<8x32xf32>
    %11 = arith.maximumf %9, %10 : vector<8x32xf32>
    %c0_11 = arith.constant 0 : index
    %c0_12 = arith.constant 0 : index
    %12 = vector.load %arg6[%c0_11, %c0_12] : memref<32x128xf32, #tpu.memory_space<vmem>>, vector<32x128xf32>
    %cst_13 = arith.constant dense<0.000000e+00> : vector<8x128xf32>
    %13 = tpu.matmul %11, %12, %cst_13 {dimension_numbers = #tpu.dot_dimension_numbers<[1], [0], [0], [1], [0, 0, 1, 1], [], []>} : vector<8x32xf32>, vector<32x128xf32>, vector<8x128xf32> -> vector<8x128xf32>
    %c0_14 = arith.constant 0 : index
    %c0_15 = arith.constant 0 : index
    %14 = vector.load %arg7[%c0_14, %c0_15] : memref<1x128xf32, #tpu.memory_space<vmem>>, vector<1x128xf32>
    %15 = vector.broadcast %14 : vector<1x128xf32> to vector<8x128xf32>
    %16 = arith.addf %13, %15 : vector<8x128xf32>
    %c0_16 = arith.constant 0 : index
    %c0_17 = arith.constant 0 : index
    %17 = vector.load %arg8[%c0_16, %c0_17] : memref<8x128xf32, #tpu.memory_space<vmem>>, vector<8x128xf32>
    tpu.vector_store %arg8[%c0_16, %c0_17], %16 {strides = array<i32>} : memref<8x128xf32, #tpu.memory_space<vmem>>, vector<8x128xf32>,
    return
  }
  func.func @transform_0(%arg0: i32) -> (i32, i32) {
    %c0_i32 = arith.constant 0 : i32
    %c0_i32_0 = arith.constant 0 : i32
    return %arg0, %c0_i32 : i32, i32
  }
  func.func @transform_1(%arg0: i32) -> (i32, i32) {
    %c0_i32 = arith.constant 0 : i32
    %c0_i32_0 = arith.constant 0 : i32
    return %arg0, %c0_i32 : i32, i32
  }
  func.func @transform_2(%arg0: i32) -> (i32, i32) {
    %c0_i32 = arith.constant 0 : i32
    %c0_i32_0 = arith.constant 0 : i32
    %c0_i32_1 = arith.constant 0 : i32
    return %c0_i32, %c0_i32_0 : i32, i32
  }
  func.func @transform_3(%arg0: i32) -> (i32, i32) {
    %c0_i32 = arith.constant 0 : i32
    %c0_i32_0 = arith.constant 0 : i32
    %c0_i32_1 = arith.constant 0 : i32
    return %c0_i32, %c0_i32_0 : i32, i32
  }
  func.func @transform_4(%arg0: i32) -> (i32, i32) {
    %c0_i32 = arith.constant 0 : i32
    %c0_i32_0 = arith.constant 0 : i32
    %c0_i32_1 = arith.constant 0 : i32
    return %c0_i32, %c0_i32_0 : i32, i32
  }
  func.func @transform_5(%arg0: i32) -> (i32, i32) {
    %c0_i32 = arith.constant 0 : i32
    %c0_i32_0 = arith.constant 0 : i32
    %c0_i32_1 = arith.constant 0 : i32
    return %c0_i32, %c0_i32_0 : i32, i32
  }
  func.func @transform_6(%arg0: i32) -> (i32, i32) {
    %c0_i32 = arith.constant 0 : i32
    %c0_i32_0 = arith.constant 0 : i32
    %c0_i32_1 = arith.constant 0 : i32
    return %c0_i32, %c0_i32_0 : i32, i32
  }
  func.func @transform_7(%arg0: i32) -> (i32, i32) {
    %c0_i32 = arith.constant 0 : i32
    %c0_i32_0 = arith.constant 0 : i32
    return %arg0, %c0_i32 : i32, i32
  }
}

</mosaic_0001>

<bundles_post_ra>
// kernel: tpu_custom_call.1
= control target key start
LH: loop header
LB: loop body
LE: loop exit
PB: predicated region body
PF: predicated region fallthrough
CT: control target
= control target key end

     0   :  { %12 = vsyncpa [#allocation3], 0  ;;  %s506_s0 = inlined_call_operand.vmem [shape: f32[8,16], index: 0, kind: input, shape index: {}]   ;;  %s507_s1 = inlined_call_operand.vmem [shape: f32[8,4], index: 1, kind: input, shape index: {}]   ;;  %s508_s2 = inlined_call_operand.hbm [shape: f32[16,32], index: 2, kind: input, shape index: {}]   ;;  %s509_s3 = inlined_call_operand.vmem [shape: f32[4,32], index: 3, kind: input, shape index: {}]   ;;  %s510_s4 = inlined_call_operand.vmem [shape: f32[1,32], index: 4, kind: input, shape index: {}]   ;;  %s511_s5 = inlined_call_operand.hbm [shape: f32[32,128], index: 5, kind: input, shape index: {}]   ;;  %s512_s6 = inlined_call_operand.vmem [shape: f32[1,128], index: 6, kind: input, shape index: {}]   ;;  %s513_s7 = inlined_call_operand.hbm [shape: f32[8,128], index: 7, kind: output, shape index: {}]  }
   0x1   :  { %13 = vsyncpa [#allocation6], 0 }
   0x2   :  { %14 = vsyncpa [#allocation4], 0  ;;  %s435_s24 = smov [#allocation2]  }
   0x3   :  { %s24_s25 = sshll.u32 %s435_s24, 4  ;;  %s25_s25 = int_to_ptr.vmem [resolvable:$true] %s24_s25 }
   0x4   :  { %s377_s26 = scalar_lea.vmem %s25_s25, 256  ;;  %p382_p1 = scmp.lt.s32.totalorder %s25_s25, %s25_s25 }
   0x5   :  { %p378_p0 = scmp.ne.s32.totalorder %s25_s25, %s377_s26  ;;  %p383_p2 = scmp.lt.s32.totalorder %s377_s26, %s377_s26 }
   0x7   :  { %p384_p3 = por %p383_p2, %p382_p1 }
   0x9   :  { %p385_p4 = pnand %p384_p3, %p378_p0 }
   0xb   :  { %388 = shalt.err (!%p385_p4)
}
   0xc   :  { %s436_s27 = smov 128   ;;  %s437_s28 = smov 8  }
   0xd   :  { %30 = dma.hbm_to_vmem [thread:$0]  %s508_s2, 256, %s25_s25, [#allocation3], %s436_s27, %s436_s27, %s437_s28  }
   0xe   :  { %s438_s8 = smov [#allocation5]  }
   0xf   :  { %s40_s9 = sshll.u32 %s438_s8, 4  ;;  %s41_s9 = int_to_ptr.vmem [resolvable:$true] %s40_s9 }
  0x10   :  { %s397_s10 = scalar_lea.vmem %s41_s9, 512  ;;  %p402_p6 = scmp.lt.s32.totalorder %s41_s9, %s41_s9 }
  0x11   :  { %p398_p5 = scmp.ne.s32.totalorder %s41_s9, %s397_s10  ;;  %p403_p7 = scmp.lt.s32.totalorder %s397_s10, %s397_s10 }
  0x13   :  { %p404_p8 = por %p403_p7, %p402_p6 }
  0x15   :  { %p405_p9 = pnand %p404_p8, %p398_p5 }
  0x17   :  { %408 = shalt.err (!%p405_p9)
}
  0x18   :  { %46 = dma.hbm_to_vmem [thread:$0]  %s511_s5, 512, %s41_s9, [#allocation6], %s436_s27, %s436_s27, %s437_s28  }
  0x19   :  { %429 = dma.done.wait [#allocation3], 256  }
  0x1a   :  { %430 = vsyncadd [#allocation3], 4294967040 }
  0x1b   :  { %431 = dma.done.wait [#allocation6], 512  }
  0x1c   :  { %432 = vsyncadd [#allocation6], 4294966784  ;;  %v439_v0 = vmov 0.0   ;;  %vm440_vm0 = vmmov 0   ;;  %vm64_vm1 = vcmask 1043456   ;;  %vm60_vm2 = vcmask 31744  }
  0x1d   :  { %339 = vmatprep.subr.mxu1 %v439_v0  ;;  %341 = vmatprep.mubr.msk.f32.mxu1 %vm440_vm0, %v439_v0  ;;  %v59_v1 = vld [vmem:[%s509_s3] sm:$0xf]  ;;  %v57_v3 = vld [vmem:[#allocation2 + $0x8] sm:$0xff]  ;;  %vm138_vm3 = vcmask 130048   ;;  %v222_v8 = vld [vmem:[#allocation5 + $0x8] sm:$0xff]  ;;  %vm232_vm4 = vcmask 261120  }
  0x1e   :  { %351 = vmatprep.subr.mxu0 %v439_v0  ;;  %359 = vmatprep.mubr.msk.f32.mxu0 %vm440_vm0, %v439_v0  ;;  %v58_v2 = vld [vmem:[%s507_s1] sm:$0xff]  ;;  %v224_v6 = vld [vmem:[#allocation5 + $0x18] sm:$0xff]  ;;  %v221_v9 = vld [vmem:[#allocation5] sm:$0xff]  ;;  %s441_s18 = smov [#allocation7]  }
  0x1f   :  { %340 = vmatpush3.msk.msra.mxu1 %vm64_vm1, %v59_v1  ;;  %v56_v4 = vld [vmem:[#allocation2] sm:$0xff]  ;;  %352 = vmatpush3.msra.mxu0 %v224_v6  ;;  %s313_s19 = sshll.u32 %s441_s18, 4  ;;  %s314_s19 = int_to_ptr.vmem [resolvable:$true] %s313_s19 }
  0x20   :  { %342 = vmatmul.mubr.msk.f32.vlgmr.msra.gmra.mxu1 %vm60_vm2, %v58_v2  ;;  %344 = vmatprep.subr.mxu1 %v439_v0  ;;  %v55_v5 = vld [vmem:[%s506_s0] sm:$0xff]  ;;  %s409_s20 = scalar_lea.vmem %s314_s19, 128  ;;  %p414_p11 = scmp.lt.s32.totalorder %s314_s19, %s314_s19 }
  0x21   :  { %345 = vmatpush3.msra.mxu1 %v57_v3  ;;  %348 = vmatprep.mubr.msk.f32.mxu1 %vm440_vm0, %v439_v0  ;;  %v223_v7 = vld [vmem:[#allocation5 + $0x10] sm:$0xff]  ;;  %p410_p10 = scmp.ne.s32.totalorder %s314_s19, %s409_s20  ;;  %p415_p12 = scmp.lt.s32.totalorder %s409_s20, %s409_s20 }
  0x22   :  { %346 = vmatprep.subr.mxu1 %v439_v0  ;;  %353 = vmatprep.subr.mxu0 %v439_v0  ;;  %v326_v13 = vld [vmem:[%s510_s4] ss:$0 sm:$0xff] }
  0x23   :  { %347 = vmatpush3.msra.mxu1 %v56_v4  ;;  %354 = vmatpush3.msra.mxu0 %v223_v7  ;;  %v327_v18 = vld [vmem:[%s512_s6] ss:$0 sm:$0xff]  ;;  %p416_p13 = por %p415_p12, %p414_p11 }
  0x24   :  { %349 = vmatmul.mubr.msk.f32.vlgmr.msra.gmra.mxu1 %vm138_vm3, %v55_v5  ;;  %355 = vmatprep.subr.mxu0 %v439_v0 }
  0x25   :  { %356 = vmatpush3.msra.mxu0 %v222_v8  ;;  %p417_p0 = pnand %p416_p13, %p410_p10 }
  0x26   :  { %357 = vmatprep.subr.mxu0 %v439_v0 }
  0x27   :  { %358 = vmatpush3.msra.mxu0 %v221_v9 }
  0xe0   :  { %v134_v10 = vpop.f32.mrf.mxu1 }
  0xe2   :  { %v343_v11 = vpop.f32.mrf.mxu1 }
  0xe4   :  { %v208_v12 = vpop.f32.mrf.mxu1 }
  0xe5   :  { %v209_v14 = vadd.f32 %v208_v12, %v134_v10 }
  0xe6   :  { %v350_v15 = vpop.f32.mrf.mxu1 }
  0xe7   :  { %v219_v16 = vadd.f32 %v326_v13, %v209_v14 }
  0xe9   :  { %v220_v17 = vmax.f32 %v219_v16, 0.0 }
  0xeb   :  { %360 = vmatmul.mubr.msk.f32.vlgmr.msra.gmra.mxu0 %vm232_vm4, %v220_v17 }
 0x1ab   :  { %v302_v19 = vpop.f32.mrf.mxu0 }
 0x1ac   :  { %v303_v20 = vadd.f32 %v327_v18, %v302_v19 }
 0x1ad   :  { %v361_v21 = vpop.f32.mrf.mxu0 }
 0x1ae   :  { %306 = vst [vmem:[#allocation7] sm:$0xff] %v303_v20 }
 0x1af   :  { %420 = shalt.err (!%p417_p0)
}
 0x1b0   :  { %316 = dma.vmem_to_hbm [thread:$0]  %s314_s19, 128, %s513_s7, [#allocation4]  }
 0x1b1   :  { %433 = dma.done.wait [#allocation4], 128  }
 0x1b2   :  { %434 = vsyncadd [#allocation4], 4294967168 }
 0x1b3   :  { %320 = vsyncpa [#allocation3], 1 }
 0x1b4   :  { %321 = vsyncpa [#allocation6], 1 }
 0x1b5   :  { %322 = vsyncpa [#allocation4], 1 }

</bundles_post_ra>
